<compile_context>
chip_gen: v6e
topology: v6e:2x2x1
jax: 0.10.0
libtpu: 0.0.40
codegen_flags: <defaults>
</compile_context>

<pallas_src>
import functools

import jax
import jax.numpy as jnp
from jax.experimental import pallas as pl
from jax.experimental.pallas import tpu as pltpu


def _policy_kernel(x_ref, w1_ref, b1_ref, w2_ref, b2_ref, w3_ref, b3_ref,
                   out_ref, *, mxu_dtype):
    # Single hoisted loads; weights arrive already in mxu_dtype (wrapper cast).
    x = x_ref[...]
    b1 = b1_ref[...]
    b2 = b2_ref[...]
    b3 = b3_ref[...]

    # fc1 + ReLU  (MXU operands optionally bf16, fp32 accumulate)
    h1 = jnp.dot(x.astype(mxu_dtype), w1_ref[...],
                 preferred_element_type=jnp.float32) + b1
    h1 = jnp.maximum(h1, 0.0)

    # fc2 + ReLU
    h2 = jnp.dot(h1.astype(mxu_dtype), w2_ref[...],
                 preferred_element_type=jnp.float32) + b2
    h2 = jnp.maximum(h2, 0.0)

    # fc3 — natural [tb, output_num] logits, no lane padding.
    logits = jnp.dot(h2.astype(mxu_dtype), w3_ref[...],
                     preferred_element_type=jnp.float32) + b3

    # Numerically stable softmax over the last axis.
    # NOTE: when B % tb != 0 the final partial tile also softmaxes the padded
    # garbage rows; those rows are clipped on writeback and the math cannot
    # produce NaN/Inf here (max-subtraction keeps exp bounded, denom >= 1 term).
    m = jnp.max(logits, axis=-1, keepdims=True)
    e = jnp.exp(logits - m)
    denom = jnp.sum(e, axis=-1, keepdims=True)
    inv = pl.reciprocal(denom, approx=False)  # EUP reciprocal + VPU multiply
    out_ref[...] = (e * inv).astype(out_ref.dtype)


def _tpu_generation_is_v7():
    try:
        kind = jax.devices()[0].device_kind.lower()
    except Exception:
        return False
    return "v7" in kind


def discrete_policy_forward(x, params, *, block_batch=16384,
                            mxu_dtype=jnp.float32):
    """x: [B, input_dim] float32; params: dict of (w1,b1,w2,b2,w3,b3)."""
    w1, b1, w2, b2, w3, b3 = (
        params["w1"], params["b1"],
        params["w2"], params["b2"],
        params["w3"], params["b3"],
    )
    B, input_dim = x.shape
    hidden = w1.shape[1]
    output_num = w3.shape[1]

    # Pre-cast the weight matrices once in the wrapper: with constant index_maps
    # they are DMA'd a single time, so this halves their HBM traffic and removes
    # per-grid-step VPU casts. Do NOT pre-cast x (extra XLA pass, more HBM).
    # Biases stay fp32 (added after the fp32 accumulation).
    w1c = w1.astype(mxu_dtype)
    w2c = w2.astype(mxu_dtype)
    w3c = w3.astype(mxu_dtype)

    # Batch tile: full (small) batch, else a large multiple of 8.
    if B <= block_batch:
        tb = B
    else:
        tb = max(8, (block_batch // 8) * 8)
    grid = (pl.cdiv(B, tb),)

    x_spec = pl.BlockSpec((tb, input_dim), lambda i: (i, 0))
    out_spec = pl.BlockSpec((tb, output_num), lambda i: (i, 0))
    # Constant index_maps: weights/biases DMA'd once, stay VMEM-resident.
    w_specs = [
        pl.BlockSpec(w1c.shape, lambda i: (0, 0)),
        pl.BlockSpec(b1.shape, lambda i: (0, 0)),
        pl.BlockSpec(w2c.shape, lambda i: (0, 0)),
        pl.BlockSpec(b2.shape, lambda i: (0, 0)),
        pl.BlockSpec(w3c.shape, lambda i: (0, 0)),
        pl.BlockSpec(b3.shape, lambda i: (0, 0)),
    ]

    # ---- Generation-aware compiler params -------------------------------
    is_v7 = _tpu_generation_is_v7()

    # Real VMEM need: double-buffered x/out tiles + resident weights + fp32
    # intermediates (h1, h2, logits/exp working set), plus headroom.
    itemsize = jnp.dtype(mxu_dtype).itemsize
    tile_bytes = 4 * tb * (input_dim + output_num)
    weight_bytes = (itemsize * (w1c.size + w2c.size + w3c.size)
                    + 4 * (b1.size + b2.size + b3.size))
    inter_bytes = 4 * tb * (2 * hidden + 2 * output_num)
    vmem_need = 2 * tile_bytes + weight_bytes + inter_bytes
    vmem_limit = int(vmem_need * 1.5) + (8 << 20)
    vmem_cap = (24 << 20) if is_v7 else (64 << 20)  # v7x: 64 MiB physical total
    vmem_limit = max(16 << 20, min(vmem_limit, vmem_cap))

    # v7x has 2 TensorCores per chip: CORE_PARALLEL actually shards the batch
    # grid across them. Plain "parallel" elsewhere (single-TC v5e/v6e).
    if is_v7 and grid[0] >= 2:
        dim_sem = (pltpu.CORE_PARALLEL,)
    else:
        dim_sem = ("parallel",)

    flops = 2 * B * (input_dim * hidden + hidden * hidden + hidden * output_num)
    bytes_accessed = 4 * (x.size + B * output_num) + weight_bytes
    cost = pl.CostEstimate(
        flops=int(flops),
        transcendentals=int(B * output_num),   # exp count, now exact (no padding)
        bytes_accessed=int(bytes_accessed),
    )

    out = pl.pallas_call(
        functools.partial(_policy_kernel, mxu_dtype=mxu_dtype),
        out_shape=jax.ShapeDtypeStruct((B, output_num), jnp.float32),
        grid=grid,
        in_specs=[x_spec] + w_specs,
        out_specs=out_spec,
        compiler_params=pltpu.CompilerParams(
            dimension_semantics=dim_sem,
            vmem_limit_bytes=vmem_limit,
        ),
        cost_estimate=cost,
    )(x, w1c, b1, w2c, b2, w3c, b3)

    return out


def init_params(key, input_dim, output_num, hidden_size=32):
    """Deterministic init mimicking nn.Linear's U(-1/sqrt(fan_in), 1/sqrt(fan_in))."""
    ks = jax.random.split(key, 6)

    def linear(kw, kb, fan_in, fan_out):
        bound = 1.0 / jnp.sqrt(jnp.float32(fan_in))
        w = jax.random.uniform(kw, (fan_in, fan_out), jnp.float32, -bound, bound)
        b = jax.random.uniform(kb, (1, fan_out), jnp.float32, -bound, bound)
        return w, b

    w1, b1 = linear(ks[0], ks[1], input_dim, hidden_size)
    w2, b2 = linear(ks[2], ks[3], hidden_size, hidden_size)
    w3, b3 = linear(ks[4], ks[5], hidden_size, output_num)
    return {"w1": w1, "b1": b1, "w2": w2, "b2": b2, "w3": w3, "b3": b3}


def _reference_forward(x, p):
    h1 = jnp.maximum(x @ p["w1"] + p["b1"], 0.0)
    h2 = jnp.maximum(h1 @ p["w2"] + p["b2"], 0.0)
    logits = h2 @ p["w3"] + p["b3"]
    return jax.nn.softmax(logits, axis=-1)


if __name__ == "__main__":
    key = jax.random.PRNGKey(0)
    k_x, k_p, k_x2 = jax.random.split(key, 3)

    input_dim = 16
    hidden_size = 32
    output_num = 8
    params = init_params(k_p, input_dim, output_num, hidden_size)

    # 1) Tiny batch (single grid step, block == full batch).
    x_small = jax.random.normal(k_x, (2, input_dim), dtype=jnp.float32)
    out_small = jax.block_until_ready(discrete_policy_forward(x_small, params))
    ref_small = _reference_forward(x_small, params)
    assert out_small.shape == (2, output_num)
    assert jnp.allclose(jnp.sum(out_small, axis=-1), 1.0, atol=1e-5)
    assert jnp.allclose(out_small, ref_small, atol=1e-5, rtol=1e-5)

    # 2) Larger batch exercising the pipelined batch grid (4 tiles of 64 rows).
    x_big = jax.random.normal(k_x2, (256, input_dim), dtype=jnp.float32)
    out_big = jax.block_until_ready(
        discrete_policy_forward(x_big, params, block_batch=64))
    ref_big = _reference_forward(x_big, params)
    assert out_big.shape == (256, output_num)
    assert jnp.allclose(out_big, ref_big, atol=1e-5, rtol=1e-5)

    # 3) Ragged batch (B % tb != 0) hits the partial-final-tile path.
    out_ragged = jax.block_until_ready(
        discrete_policy_forward(x_big[:200], params, block_batch=64))
    assert out_ragged.shape == (200, output_num)
    assert jnp.allclose(out_ragged, ref_big[:200], atol=1e-5, rtol=1e-5)

    # 4) bf16-MXU variant (v6e/v7x fast path); weights pre-cast in the wrapper,
    #    elementwise math stays fp32.
    out_bf16 = jax.block_until_ready(
        discrete_policy_forward(x_big, params, block_batch=64,
                                mxu_dtype=jnp.bfloat16))
    assert jnp.allclose(jnp.sum(out_bf16, axis=-1), 1.0, atol=1e-3)
    assert jnp.allclose(out_bf16, ref_big, atol=3e-2, rtol=3e-2)

    print("KERNEL_OK")
</pallas_src>

<mosaic_0001>
module attributes {stable_mosaic.version = 11 : i64} {
  func.func @_policy_kernel(%arg0: i32, %arg1: memref<2x16xf32, #tpu.memory_space<vmem>>, %arg2: memref<16x32xf32, #tpu.memory_space<vmem>>, %arg3: memref<1x32xf32, #tpu.memory_space<vmem>>, %arg4: memref<32x32xf32, #tpu.memory_space<vmem>>, %arg5: memref<1x32xf32, #tpu.memory_space<vmem>>, %arg6: memref<32x8xf32, #tpu.memory_space<vmem>>, %arg7: memref<1x8xf32, #tpu.memory_space<vmem>>, %arg8: memref<2x8xf32, #tpu.memory_space<vmem>>) attributes {dimension_semantics = [#tpu.dimension_semantics<parallel>], iteration_bounds = array<i64: 1>, scalar_prefetch = 0 : i64, scratch_operands = 0 : i64, tpu.core_type = #tpu.core_type<tc>, window_params = [{transform_indices = @transform_0, window_bounds = array<i64: 2, 16>}, {pipeline_mode = #tpu.pipeline_mode<synchronous>, transform_indices = @transform_1, window_bounds = array<i64: 16, 32>}, {pipeline_mode = #tpu.pipeline_mode<synchronous>, transform_indices = @transform_2, window_bounds = array<i64: 1, 32>}, {pipeline_mode = #tpu.pipeline_mode<synchronous>, transform_indices = @transform_3, window_bounds = array<i64: 32, 32>}, {pipeline_mode = #tpu.pipeline_mode<synchronous>, transform_indices = @transform_4, window_bounds = array<i64: 1, 32>}, {pipeline_mode = #tpu.pipeline_mode<synchronous>, transform_indices = @transform_5, window_bounds = array<i64: 32, 8>}, {pipeline_mode = #tpu.pipeline_mode<synchronous>, transform_indices = @transform_6, window_bounds = array<i64: 1, 8>}, {transform_indices = @transform_7, window_bounds = array<i64: 2, 8>}]} {
    %c0 = arith.constant 0 : index
    %c0_0 = arith.constant 0 : index
    %0 = vector.load %arg1[%c0, %c0_0] : memref<2x16xf32, #tpu.memory_space<vmem>>, vector<2x16xf32>
    %c0_1 = arith.constant 0 : index
    %c0_2 = arith.constant 0 : index
    %1 = vector.load %arg3[%c0_1, %c0_2] : memref<1x32xf32, #tpu.memory_space<vmem>>, vector<1x32xf32>
    %c0_3 = arith.constant 0 : index
    %c0_4 = arith.constant 0 : index
    %2 = vector.load %arg5[%c0_3, %c0_4] : memref<1x32xf32, #tpu.memory_space<vmem>>, vector<1x32xf32>
    %c0_5 = arith.constant 0 : index
    %c0_6 = arith.constant 0 : index
    %3 = vector.load %arg7[%c0_5, %c0_6] : memref<1x8xf32, #tpu.memory_space<vmem>>, vector<1x8xf32>
    %c0_7 = arith.constant 0 : index
    %c0_8 = arith.constant 0 : index
    %4 = vector.load %arg2[%c0_7, %c0_8] : memref<16x32xf32, #tpu.memory_space<vmem>>, vector<16x32xf32>
    %cst = arith.constant dense<0.000000e+00> : vector<2x32xf32>
    %5 = tpu.matmul %0, %4, %cst {dimension_numbers = #tpu.dot_dimension_numbers<[1], [0], [0], [1], [0, 0, 1, 1], [], []>} : vector<2x16xf32>, vector<16x32xf32>, vector<2x32xf32> -> vector<2x32xf32>
    %6 = vector.broadcast %1 : vector<1x32xf32> to vector<2x32xf32>
    %7 = arith.addf %5, %6 : vector<2x32xf32>
    %cst_9 = arith.constant 0.000000e+00 : f32
    %8 = vector.broadcast %cst_9 : f32 to vector<2x32xf32>
    %9 = arith.maximumf %7, %8 : vector<2x32xf32>
    %c0_10 = arith.constant 0 : index
    %c0_11 = arith.constant 0 : index
    %10 = vector.load %arg4[%c0_10, %c0_11] : memref<32x32xf32, #tpu.memory_space<vmem>>, vector<32x32xf32>
    %cst_12 = arith.constant dense<0.000000e+00> : vector<2x32xf32>
    %11 = tpu.matmul %9, %10, %cst_12 {dimension_numbers = #tpu.dot_dimension_numbers<[1], [0], [0], [1], [0, 0, 1, 1], [], []>} : vector<2x32xf32>, vector<32x32xf32>, vector<2x32xf32> -> vector<2x32xf32>
    %12 = vector.broadcast %2 : vector<1x32xf32> to vector<2x32xf32>
    %13 = arith.addf %11, %12 : vector<2x32xf32>
    %cst_13 = arith.constant 0.000000e+00 : f32
    %14 = vector.broadcast %cst_13 : f32 to vector<2x32xf32>
    %15 = arith.maximumf %13, %14 : vector<2x32xf32>
    %c0_14 = arith.constant 0 : index
    %c0_15 = arith.constant 0 : index
    %16 = vector.load %arg6[%c0_14, %c0_15] : memref<32x8xf32, #tpu.memory_space<vmem>>, vector<32x8xf32>
    %cst_16 = arith.constant dense<0.000000e+00> : vector<2x8xf32>
    %17 = tpu.matmul %15, %16, %cst_16 {dimension_numbers = #tpu.dot_dimension_numbers<[1], [0], [0], [1], [0, 0, 1, 1], [], []>} : vector<2x32xf32>, vector<32x8xf32>, vector<2x8xf32> -> vector<2x8xf32>
    %18 = vector.broadcast %3 : vector<1x8xf32> to vector<2x8xf32>
    %19 = arith.addf %17, %18 : vector<2x8xf32>
    %cst_17 = arith.constant dense<0xFF800000> : vector<2xf32>
    %20 = vector.multi_reduction <maximumf>, %19, %cst_17 [1] : vector<2x8xf32> to vector<2xf32>
    %21 = vector.shape_cast %20 : vector<2xf32> to vector<2x1xf32>
    %22 = vector.broadcast %21 : vector<2x1xf32> to vector<2x8xf32>
    %23 = arith.subf %19, %22 : vector<2x8xf32>
    %24 = math.exp %23 : vector<2x8xf32>
    %cst_18 = arith.constant dense<0.000000e+00> : vector<2xf32>
    %25 = vector.multi_reduction <add>, %24, %cst_18 [1] : vector<2x8xf32> to vector<2xf32>
    %26 = vector.shape_cast %25 : vector<2xf32> to vector<2x1xf32>
    %27 = tpu.reciprocal %26 : vector<2x1xf32> -> vector<2x1xf32>
    %28 = vector.broadcast %27 : vector<2x1xf32> to vector<2x8xf32>
    %29 = arith.mulf %24, %28 : vector<2x8xf32>
    %c0_19 = arith.constant 0 : index
    %c0_20 = arith.constant 0 : index
    %30 = vector.load %arg8[%c0_19, %c0_20] : memref<2x8xf32, #tpu.memory_space<vmem>>, vector<2x8xf32>
    tpu.vector_store %arg8[%c0_19, %c0_20], %29 {strides = array<i32>} : memref<2x8xf32, #tpu.memory_space<vmem>>, vector<2x8xf32>,
    return
  }
  func.func @transform_0(%arg0: i32) -> (i32, i32) {
    %c0_i32 = arith.constant 0 : i32
    %c0_i32_0 = arith.constant 0 : i32
    return %arg0, %c0_i32 : i32, i32
  }
  func.func @transform_1(%arg0: i32) -> (i32, i32) {
    %c0_i32 = arith.constant 0 : i32
    %c0_i32_0 = arith.constant 0 : i32
    %c0_i32_1 = arith.constant 0 : i32
    return %c0_i32, %c0_i32_0 : i32, i32
  }
  func.func @transform_2(%arg0: i32) -> (i32, i32) {
    %c0_i32 = arith.constant 0 : i32
    %c0_i32_0 = arith.constant 0 : i32
    %c0_i32_1 = arith.constant 0 : i32
    return %c0_i32, %c0_i32_0 : i32, i32
  }
  func.func @transform_3(%arg0: i32) -> (i32, i32) {
    %c0_i32 = arith.constant 0 : i32
    %c0_i32_0 = arith.constant 0 : i32
    %c0_i32_1 = arith.constant 0 : i32
    return %c0_i32, %c0_i32_0 : i32, i32
  }
  func.func @transform_4(%arg0: i32) -> (i32, i32) {
    %c0_i32 = arith.constant 0 : i32
    %c0_i32_0 = arith.constant 0 : i32
    %c0_i32_1 = arith.constant 0 : i32
    return %c0_i32, %c0_i32_0 : i32, i32
  }
  func.func @transform_5(%arg0: i32) -> (i32, i32) {
    %c0_i32 = arith.constant 0 : i32
    %c0_i32_0 = arith.constant 0 : i32
    %c0_i32_1 = arith.constant 0 : i32
    return %c0_i32, %c0_i32_0 : i32, i32
  }
  func.func @transform_6(%arg0: i32) -> (i32, i32) {
    %c0_i32 = arith.constant 0 : i32
    %c0_i32_0 = arith.constant 0 : i32
    %c0_i32_1 = arith.constant 0 : i32
    return %c0_i32, %c0_i32_0 : i32, i32
  }
  func.func @transform_7(%arg0: i32) -> (i32, i32) {
    %c0_i32 = arith.constant 0 : i32
    %c0_i32_0 = arith.constant 0 : i32
    return %arg0, %c0_i32 : i32, i32
  }
}

</mosaic_0001>

<bundles_post_ra>
// kernel: tpu_custom_call.1
= control target key start
LH: loop header
LB: loop body
LE: loop exit
PB: predicated region body
PF: predicated region fallthrough
CT: control target
= control target key end

     0   :  { %12 = vsyncpa [#allocation3], 0  ;;  %s522_s0 = inlined_call_operand.vmem [shape: f32[2,16], index: 0, kind: input, shape index: {}]   ;;  %s523_s1 = inlined_call_operand.hbm [shape: f32[16,32], index: 1, kind: input, shape index: {}]   ;;  %s524_s2 = inlined_call_operand.vmem [shape: f32[1,32], index: 2, kind: input, shape index: {}]   ;;  %s525_s3 = inlined_call_operand.vmem [shape: f32[32,32], index: 3, kind: input, shape index: {}]   ;;  %s526_s4 = inlined_call_operand.vmem [shape: f32[1,32], index: 4, kind: input, shape index: {}]   ;;  %s527_s5 = inlined_call_operand.vmem [shape: f32[32,8], index: 5, kind: input, shape index: {}]   ;;  %s528_s6 = inlined_call_operand.vmem [shape: f32[1,8], index: 6, kind: input, shape index: {}]   ;;  %s529_s7 = inlined_call_operand.hbm [shape: f32[2,8], index: 7, kind: output, shape index: {}]  }
   0x1   :  { %13 = vsyncpa [#allocation4], 0  ;;  %s426_s24 = smov [#allocation2]  }
   0x2   :  { %s21_s25 = sshll.u32 %s426_s24, 4  ;;  %s22_s25 = int_to_ptr.vmem [resolvable:$true] %s21_s25 }
   0x3   :  { %s390_s26 = scalar_lea.vmem %s22_s25, 256  ;;  %p395_p1 = scmp.lt.s32.totalorder %s22_s25, %s22_s25 }
   0x4   :  { %p391_p0 = scmp.ne.s32.totalorder %s22_s25, %s390_s26  ;;  %p396_p2 = scmp.lt.s32.totalorder %s390_s26, %s390_s26 }
   0x6   :  { %p397_p3 = por %p396_p2, %p395_p1 }
   0x8   :  { %p398_p4 = pnand %p397_p3, %p391_p0 }
   0xa   :  { %401 = shalt.err (!%p398_p4)
}
   0xb   :  { %s427_s27 = smov 128   ;;  %s428_s28 = smov 8  }
   0xc   :  { %27 = dma.hbm_to_vmem [thread:$0]  %s523_s1, 256, %s22_s25, [#allocation3], %s427_s27, %s427_s27, %s428_s28  }
   0xd   :  { %422 = dma.done.wait [#allocation3], 256  }
   0xe   :  { %423 = vsyncadd [#allocation3], 4294967040  ;;  %v429_v0 = vmov 0.0   ;;  %vm430_vm0 = vmmov 0   ;;  %v46_v1 = vld [vmem:[#allocation2 + $0x8] sm:$0xff]  ;;  %v45_v2 = vld [vmem:[#allocation2] sm:$0xff] }
   0xf   :  { %343 = vmatprep.subr.mxu0 %v429_v0  ;;  %347 = vmatprep.mubr.msk.f32.mxu0 %vm430_vm0, %v429_v0  ;;  %v41_v3 = vld [vmem:[%s522_s0] sm:$0x3]  ;;  %vm53_vm1 = vcmask 130048   ;;  %v131_v4 = vld [vmem:[%s525_s3 + $0x18] sm:$0xff]  ;;  %v130_v5 = vld [vmem:[%s525_s3 + $0x10] sm:$0xff]  ;;  %vm138_vm2 = vcmask 261120  }
  0x10   :  { %350 = vmatprep.subr.mxu1 %v429_v0  ;;  %358 = vmatprep.mubr.msk.f32.mxu1 %vm430_vm0, %v429_v0  ;;  %v129_v6 = vld [vmem:[%s525_s3 + $0x8] sm:$0xff]  ;;  %v128_v7 = vld [vmem:[%s525_s3] sm:$0xff]  ;;  %v216_v8 = vld [vmem:[%s527_s5 + $0x18] sm:$0xff]  ;;  %vm296_vm3 = vcmask 58368  }
  0x11   :  { %344 = vmatpush3.msra.mxu0 %v46_v1  ;;  %351 = vmatpush3.msra.mxu1 %v131_v4  ;;  %v324_v9 = vld [vmem:[%s524_s2] ss:$0 sm:$0xff]  ;;  %v215_v14 = vld [vmem:[%s527_s5 + $0x10] sm:$0xff]  ;;  %v214_v15 = vld [vmem:[%s527_s5 + $0x8] sm:$0xff] }
  0x12   :  { %345 = vmatprep.subr.mxu0 %v429_v0  ;;  %352 = vmatprep.subr.mxu1 %v429_v0  ;;  %v213_v16 = vld [vmem:[%s527_s5] sm:$0xff] }
  0x13   :  { %346 = vmatpush3.msra.mxu0 %v45_v2  ;;  %353 = vmatpush3.msra.mxu1 %v130_v5  ;;  %v326_v17 = vld [vmem:[%s526_s4] ss:$0 sm:$0xff]  ;;  %s431_s4 = smov [#allocation5]  }
  0x14   :  { %348 = vmatmul.mubr.msk.f32.vlgmr.msra.gmra.mxu0 %vm53_vm1, %v41_v3  ;;  %361 = vmatprep.subr.mxu0 %v429_v0  ;;  %v328_v22 = vld [vmem:[%s528_s6] ss:$0 sm:$0xff]  ;;  %s315_s5 = sshll.u32 %s431_s4, 4  ;;  %s316_s5 = int_to_ptr.vmem [resolvable:$true] %s315_s5 }
  0x15   :  { %369 = vmatprep.mubr.msk.f32.mxu0 %vm430_vm0, %v429_v0  ;;  %354 = vmatprep.subr.mxu1 %v429_v0  ;;  %s402_s6 = scalar_lea.vmem %s316_s5, 32  ;;  %p407_p6 = scmp.lt.s32.totalorder %s316_s5, %s316_s5 }
  0x16   :  { %355 = vmatpush3.msra.mxu1 %v129_v6  ;;  %362 = vmatpush3.msra.mxu0 %v216_v8  ;;  %p403_p5 = scmp.ne.s32.totalorder %s316_s5, %s402_s6  ;;  %p408_p7 = scmp.lt.s32.totalorder %s402_s6, %s402_s6 }
  0x17   :  { %356 = vmatprep.subr.mxu1 %v429_v0  ;;  %363 = vmatprep.subr.mxu0 %v429_v0 }
  0x18   :  { %357 = vmatpush3.msra.mxu1 %v128_v7  ;;  %364 = vmatpush3.msra.mxu0 %v215_v14  ;;  %p409_p8 = por %p408_p7, %p407_p6 }
  0x19   :  { %365 = vmatprep.subr.mxu0 %v429_v0 }
  0x1a   :  { %366 = vmatpush3.msra.mxu0 %v214_v15  ;;  %p410_p9 = pnand %p409_p8, %p403_p5 }
  0x1b   :  { %367 = vmatprep.subr.mxu0 %v429_v0 }
  0x1c   :  { %368 = vmatpush3.msra.mxu0 %v213_v16 }
  0xd4   :  { %v123_v10 = vpop.f32.mrf.mxu0 }
  0xd5   :  { %v124_v11 = vadd.f32 %v324_v9, %v123_v10 }
  0xd6   :  { %v349_v12 = vpop.f32.mrf.mxu0 }
  0xd7   :  { %v127_v13 = vmax.f32 %v124_v11, 0.0 }
  0xd9   :  { %359 = vmatmul.mubr.msk.f32.vlgmr.msra.gmra.mxu1 %vm138_vm2, %v127_v13 }
 0x199   :  { %v208_v18 = vpop.f32.mrf.mxu1 }
 0x19a   :  { %v209_v19 = vadd.f32 %v326_v17, %v208_v18 }
 0x19b   :  { %v360_v20 = vpop.f32.mrf.mxu1 }
 0x19c   :  { %v212_v21 = vmax.f32 %v209_v19, 0.0 }
 0x19e   :  { %370 = vmatmul.mubr.msk.f32.vlgmr.msra.gmra.mxu0 %vm138_vm2, %v212_v21 }
 0x25e   :  { %v292_v23 = vpop.f32.mrf.mxu0 }
 0x25f   :  { %v293_v24 = vadd.f32 %v328_v22, %v292_v23 }
 0x260   :  { %v371_v25 = vpop.f32.mrf.mxu0 }
 0x261   :  { %v297_v26 = vsel %vm296_vm3, %v293_v24, -inf }
 0x262   :  { %298 = vmax.xlane.f32.xlu0 %v297_v26 }
 0x2eb   :  { %v299_v27 = vpop.xlane.xlu0 %298 }
 0x2ec   :  { %v300_v28 = vsub.f32 %v293_v24, %v299_v27 }
 0x2ee   :  { %v301_v29 = vmul.f32 1.442695, %v300_v28 }
 0x2f0   :  { %378 = vpow2.f32 %v301_v29 }
 0x2fd   :  { %v379_v30 = vpop.eup %378 }
 0x2fe   :  { %v303_v31 = vsel %vm296_vm3, %v379_v30, 0.0 }
 0x2ff   :  { %304 = vadd.xlane.f32.xlu0 %v303_v31 }
 0x388   :  { %v305_v32 = vpop.xlane.xlu0 %304 }
 0x389   :  { %380 = vrcp.f32 %v305_v32 }
 0x396   :  { %v381_v33 = vpop.eup %380 }
 0x397   :  { %v307_v34 = vmul.f32 %v381_v33, %v379_v30 }
 0x399   :  { %308 = vst.msk [vmem:[#allocation5] sm:$0x3] %vm296_vm3, %v307_v34 }
 0x39a   :  { %413 = shalt.err (!%p410_p9)
}
 0x39b   :  { %318 = dma.vmem_to_hbm [thread:$0]  %s316_s5, 32, %s529_s7, [#allocation4]  }
 0x39c   :  { %424 = dma.done.wait [#allocation4], 32  }
 0x39d   :  { %425 = vsyncadd [#allocation4], 4294967264 }
 0x39e   :  { %322 = vsyncpa [#allocation3], 1 }
 0x39f   :  { %323 = vsyncpa [#allocation4], 1 }

</bundles_post_ra>
